<compile_context>
chip_gen: v7x
topology: tpu7x:2x2x1
jax: 0.10.0
libtpu: 0.0.40
codegen_flags: <defaults>
</compile_context>

<pallas_src>
import numpy as np
import jax
import jax.numpy as jnp
from jax.experimental import pallas as pl
from jax.experimental.pallas import tpu as pltpu


def _resize_crop_matrix(in_size: int, resized_size: int, crop_size: int, crop_off: int) -> np.ndarray:
    """Rows [crop_off, crop_off+crop_size) of the bilinear-resize matrix (resized_size, in_size)."""
    scale = in_size / resized_size
    j = np.arange(resized_size, dtype=np.float64)
    src = (j + 0.5) * scale - 0.5
    src = np.clip(src, 0.0, None)                       # PyTorch clamps negative source coords
    i0 = np.minimum(np.floor(src).astype(np.int64), in_size - 1)
    frac = src - i0
    i1 = np.minimum(i0 + 1, in_size - 1)
    W = np.zeros((resized_size, in_size), dtype=np.float32)
    rows = np.arange(resized_size)
    np.add.at(W, (rows, i0), (1.0 - frac).astype(np.float32))
    np.add.at(W, (rows, i1), frac.astype(np.float32))
    return W[crop_off:crop_off + crop_size]


def _resized_hw(H: int, W: int, resize_size: int):
    """torchvision Resize(int): shortest side -> resize_size, keep aspect ratio."""
    if H <= W:
        return resize_size, int(resize_size * W / H)
    return int(resize_size * H / W), resize_size


def _imagenet_eval_kernel(scale_ref, bias_ref, wh_ref, wwt_ref, img_ref, out_ref):
    # wh: (crop, H_in) f32, wwt: (W_in, crop) f32 (pre-transposed on host), img: (1, C, H_in, W_in) u8
    wh = wh_ref[...]
    wwt = wwt_ref[...]
    C = out_ref.shape[1]
    for c in range(C):                                   # static, tiny (C == 3)
        img_c = img_ref[0, c].astype(jnp.float32)        # u8 -> f32 inside VMEM
        tmp = jnp.dot(wh, img_c, preferred_element_type=jnp.float32)   # (crop, W_in)
        res = jnp.dot(tmp, wwt, preferred_element_type=jnp.float32)    # (crop, crop)
        res = jnp.round(res)                             # torchvision casts resized image back to uint8
        out_ref[0, c] = res * scale_ref[c] - bias_ref[c]  # (x/255 - mean) / std, folded


def imagenet_eval(img_u8,
                  crop_size: int,
                  resize_size: int = 256,
                  mean=(0.485, 0.456, 0.406),
                  std=(0.229, 0.224, 0.225)):
    N, C, H, W = img_u8.shape
    assert img_u8.dtype == jnp.uint8
    assert C == len(mean) == len(std)

    new_h, new_w = _resized_hw(H, W, resize_size)
    assert crop_size <= new_h and crop_size <= new_w, "CenterCrop padding path not supported"
    top = int(round((new_h - crop_size) / 2.0))          # torchvision CenterCrop offsets
    left = int(round((new_w - crop_size) / 2.0))

    wh = jnp.asarray(_resize_crop_matrix(H, new_h, crop_size, top))                          # (crop, H)
    wwt = jnp.asarray(np.ascontiguousarray(_resize_crop_matrix(W, new_w, crop_size, left).T))  # (W, crop)

    std_np = np.asarray(std, dtype=np.float32)
    mean_np = np.asarray(mean, dtype=np.float32)
    scale_a = jnp.asarray(1.0 / (255.0 * std_np), dtype=jnp.float32)   # per-channel scale
    bias_a = jnp.asarray(mean_np / std_np, dtype=jnp.float32)          # per-channel bias

    # VMEM budget: double-buffered u8 image block + f32 output block + weights (+ headroom).
    img_block_bytes = C * H * W
    out_block_bytes = C * crop_size * crop_size * 4
    weight_bytes = (crop_size * H + W * crop_size) * 4
    vmem_need = 2 * (img_block_bytes + out_block_bytes) + 2 * weight_bytes
    vmem_limit = int(min(max(2 * vmem_need, 32 * 1024 * 1024), 100 * 1024 * 1024))

    return pl.pallas_call(
        _imagenet_eval_kernel,
        out_shape=jax.ShapeDtypeStruct((N, C, crop_size, crop_size), jnp.float32),
        grid_spec=pltpu.PrefetchScalarGridSpec(
            num_scalar_prefetch=0,
            grid=(N,),
            in_specs=[
                pl.BlockSpec(memory_space=pltpu.MemorySpace.SMEM),          # scale (C,)
                pl.BlockSpec(memory_space=pltpu.MemorySpace.SMEM),          # bias  (C,)
                pl.BlockSpec((crop_size, H), lambda n: (0, 0)),             # Wh (grid-invariant)
                pl.BlockSpec((W, crop_size), lambda n: (0, 0)),             # Ww^T (grid-invariant)
                pl.BlockSpec((1, C, H, W), lambda n: (n, 0, 0, 0)),         # uint8 image, per-batch block
            ],
            out_specs=pl.BlockSpec((1, C, crop_size, crop_size),
                                   lambda n: (n, 0, 0, 0)),
        ),
        compiler_params=pltpu.CompilerParams(
            dimension_semantics=("parallel",),       # batch axis shardable across v7x's 2 TCs
            vmem_limit_bytes=vmem_limit),
    )(scale_a, bias_a, wh, wwt, img_u8)


def _reference(img_u8, crop_size, resize_size, mean, std):
    """Pure-numpy mirror of the same math for a sanity check."""
    img = np.asarray(img_u8, dtype=np.float64)
    N, C, H, W = img.shape
    new_h, new_w = _resized_hw(H, W, resize_size)
    top = int(round((new_h - crop_size) / 2.0))
    left = int(round((new_w - crop_size) / 2.0))
    wh = _resize_crop_matrix(H, new_h, crop_size, top).astype(np.float64)
    ww = _resize_crop_matrix(W, new_w, crop_size, left).astype(np.float64)
    res = np.einsum('kh,nchw,jw->nckj', wh, img, ww)
    res = np.round(res)
    mean = np.asarray(mean, dtype=np.float64).reshape(1, -1, 1, 1)
    std = np.asarray(std, dtype=np.float64).reshape(1, -1, 1, 1)
    return (res / 255.0 - mean) / std


if __name__ == "__main__":
    # TODO(synk): the PIL-input branch (F.pil_to_tensor) has no Pallas equivalent; tensor path only.
    key = jax.random.PRNGKey(0)
    N, C, H, W = 2, 3, 16, 16
    crop_size, resize_size = 8, 12
    mean = (0.485, 0.456, 0.406)
    std = (0.229, 0.224, 0.225)

    img = jax.random.randint(key, (N, C, H, W), 0, 256, dtype=jnp.int32).astype(jnp.uint8)

    out = imagenet_eval(img, crop_size=crop_size, resize_size=resize_size, mean=mean, std=std)
    out = jax.block_until_ready(out)

    assert out.shape == (N, C, crop_size, crop_size)
    assert out.dtype == jnp.float32
    assert bool(jnp.all(jnp.isfinite(out)))

    ref = _reference(np.asarray(img), crop_size, resize_size, mean, std)
    # loose atol: MXU f32 vs float64 near a .5 rounding boundary can flip one LSB of 1/255
    assert np.max(np.abs(np.asarray(out, dtype=np.float64) - ref)) < 3e-2

    print("KERNEL_OK")
</pallas_src>

<mosaic_0001>
module attributes {stable_mosaic.version = 11 : i64} {
  func.func @_imagenet_eval_kernel(%arg0: i32, %arg1: memref<3xf32, #tpu.memory_space<smem>>, %arg2: memref<3xf32, #tpu.memory_space<smem>>, %arg3: memref<8x16xf32, #tpu.memory_space<vmem>>, %arg4: memref<16x8xf32, #tpu.memory_space<vmem>>, %arg5: memref<1x3x16x16xi8, #tpu.memory_space<vmem>>, %arg6: memref<1x3x8x8xf32, #tpu.memory_space<vmem>>) attributes {dimension_semantics = [#tpu.dimension_semantics<parallel>], iteration_bounds = array<i64: 2>, scalar_prefetch = 0 : i64, scratch_operands = 0 : i64, tpu.core_type = #tpu.core_type<tc>, window_params = [{transform_indices = @transform_0, window_bounds = array<i64: 3>}, {transform_indices = @transform_1, window_bounds = array<i64: 3>}, {pipeline_mode = #tpu.pipeline_mode<synchronous>, transform_indices = @transform_2, window_bounds = array<i64: 8, 16>}, {pipeline_mode = #tpu.pipeline_mode<synchronous>, transform_indices = @transform_3, window_bounds = array<i64: 16, 8>}, {transform_indices = @transform_4, window_bounds = array<i64: 1, 3, 16, 16>}, {transform_indices = @transform_5, window_bounds = array<i64: 1, 3, 8, 8>}]} {
    %c0 = arith.constant 0 : index
    %c0_0 = arith.constant 0 : index
    %0 = vector.load %arg3[%c0, %c0_0] : memref<8x16xf32, #tpu.memory_space<vmem>>, vector<8x16xf32>
    %c0_1 = arith.constant 0 : index
    %c0_2 = arith.constant 0 : index
    %1 = vector.load %arg4[%c0_1, %c0_2] : memref<16x8xf32, #tpu.memory_space<vmem>>, vector<16x8xf32>
    %c0_3 = arith.constant 0 : index
    %c0_4 = arith.constant 0 : index
    %c0_5 = arith.constant 0 : index
    %c0_6 = arith.constant 0 : index
    %2 = vector.load %arg5[%c0_3, %c0_4, %c0_5, %c0_6] : memref<1x3x16x16xi8, #tpu.memory_space<vmem>>, vector<1x1x16x16xi8>
    %3 = vector.shape_cast %2 : vector<1x1x16x16xi8> to vector<16x16xi8>
    %4 = arith.uitofp %3 : vector<16x16xi8> to vector<16x16xf32>
    %cst = arith.constant dense<0.000000e+00> : vector<8x16xf32>
    %5 = tpu.matmul %0, %4, %cst {dimension_numbers = #tpu.dot_dimension_numbers<[1], [0], [0], [1], [0, 0, 1, 1], [], []>} : vector<8x16xf32>, vector<16x16xf32>, vector<8x16xf32> -> vector<8x16xf32>
    %cst_7 = arith.constant dense<0.000000e+00> : vector<8x8xf32>
    %6 = tpu.matmul %5, %1, %cst_7 {dimension_numbers = #tpu.dot_dimension_numbers<[1], [0], [0], [1], [0, 0, 1, 1], [], []>} : vector<8x16xf32>, vector<16x8xf32>, vector<8x8xf32> -> vector<8x8xf32>
    %7 = math.roundeven %6 : vector<8x8xf32>
    %c0_8 = arith.constant 0 : index
    %8 = memref.load %arg1[%c0_8] : memref<3xf32, #tpu.memory_space<smem>>
    %9 = vector.broadcast %8 : f32 to vector<8x8xf32>
    %10 = arith.mulf %7, %9 : vector<8x8xf32>
    %c0_9 = arith.constant 0 : index
    %11 = memref.load %arg2[%c0_9] : memref<3xf32, #tpu.memory_space<smem>>
    %12 = vector.broadcast %11 : f32 to vector<8x8xf32>
    %13 = arith.subf %10, %12 : vector<8x8xf32>
    %c0_10 = arith.constant 0 : index
    %c0_11 = arith.constant 0 : index
    %c0_12 = arith.constant 0 : index
    %c0_13 = arith.constant 0 : index
    %14 = vector.load %arg6[%c0_10, %c0_11, %c0_12, %c0_13] : memref<1x3x8x8xf32, #tpu.memory_space<vmem>>, vector<1x1x8x8xf32>
    %15 = vector.shape_cast %14 : vector<1x1x8x8xf32> to vector<8x8xf32>
    %16 = vector.shape_cast %13 : vector<8x8xf32> to vector<1x1x8x8xf32>
    tpu.vector_store %arg6[%c0_10, %c0_11, %c0_12, %c0_13], %16 {strides = array<i32>} : memref<1x3x8x8xf32, #tpu.memory_space<vmem>>, vector<1x1x8x8xf32>,
    %c0_14 = arith.constant 0 : index
    %c1 = arith.constant 1 : index
    %c0_15 = arith.constant 0 : index
    %c0_16 = arith.constant 0 : index
    %17 = vector.load %arg5[%c0_14, %c1, %c0_15, %c0_16] : memref<1x3x16x16xi8, #tpu.memory_space<vmem>>, vector<1x1x16x16xi8>
    %18 = vector.shape_cast %17 : vector<1x1x16x16xi8> to vector<16x16xi8>
    %19 = arith.uitofp %18 : vector<16x16xi8> to vector<16x16xf32>
    %cst_17 = arith.constant dense<0.000000e+00> : vector<8x16xf32>
    %20 = tpu.matmul %0, %19, %cst_17 {dimension_numbers = #tpu.dot_dimension_numbers<[1], [0], [0], [1], [0, 0, 1, 1], [], []>} : vector<8x16xf32>, vector<16x16xf32>, vector<8x16xf32> -> vector<8x16xf32>
    %cst_18 = arith.constant dense<0.000000e+00> : vector<8x8xf32>
    %21 = tpu.matmul %20, %1, %cst_18 {dimension_numbers = #tpu.dot_dimension_numbers<[1], [0], [0], [1], [0, 0, 1, 1], [], []>} : vector<8x16xf32>, vector<16x8xf32>, vector<8x8xf32> -> vector<8x8xf32>
    %22 = math.roundeven %21 : vector<8x8xf32>
    %c1_19 = arith.constant 1 : index
    %23 = memref.load %arg1[%c1_19] : memref<3xf32, #tpu.memory_space<smem>>
    %24 = vector.broadcast %23 : f32 to vector<8x8xf32>
    %25 = arith.mulf %22, %24 : vector<8x8xf32>
    %c1_20 = arith.constant 1 : index
    %26 = memref.load %arg2[%c1_20] : memref<3xf32, #tpu.memory_space<smem>>
    %27 = vector.broadcast %26 : f32 to vector<8x8xf32>
    %28 = arith.subf %25, %27 : vector<8x8xf32>
    %c0_21 = arith.constant 0 : index
    %c1_22 = arith.constant 1 : index
    %c0_23 = arith.constant 0 : index
    %c0_24 = arith.constant 0 : index
    %29 = vector.load %arg6[%c0_21, %c1_22, %c0_23, %c0_24] : memref<1x3x8x8xf32, #tpu.memory_space<vmem>>, vector<1x1x8x8xf32>
    %30 = vector.shape_cast %29 : vector<1x1x8x8xf32> to vector<8x8xf32>
    %31 = vector.shape_cast %28 : vector<8x8xf32> to vector<1x1x8x8xf32>
    tpu.vector_store %arg6[%c0_21, %c1_22, %c0_23, %c0_24], %31 {strides = array<i32>} : memref<1x3x8x8xf32, #tpu.memory_space<vmem>>, vector<1x1x8x8xf32>,
    %c0_25 = arith.constant 0 : index
    %c2 = arith.constant 2 : index
    %c0_26 = arith.constant 0 : index
    %c0_27 = arith.constant 0 : index
    %32 = vector.load %arg5[%c0_25, %c2, %c0_26, %c0_27] : memref<1x3x16x16xi8, #tpu.memory_space<vmem>>, vector<1x1x16x16xi8>
    %33 = vector.shape_cast %32 : vector<1x1x16x16xi8> to vector<16x16xi8>
    %34 = arith.uitofp %33 : vector<16x16xi8> to vector<16x16xf32>
    %cst_28 = arith.constant dense<0.000000e+00> : vector<8x16xf32>
    %35 = tpu.matmul %0, %34, %cst_28 {dimension_numbers = #tpu.dot_dimension_numbers<[1], [0], [0], [1], [0, 0, 1, 1], [], []>} : vector<8x16xf32>, vector<16x16xf32>, vector<8x16xf32> -> vector<8x16xf32>
    %cst_29 = arith.constant dense<0.000000e+00> : vector<8x8xf32>
    %36 = tpu.matmul %35, %1, %cst_29 {dimension_numbers = #tpu.dot_dimension_numbers<[1], [0], [0], [1], [0, 0, 1, 1], [], []>} : vector<8x16xf32>, vector<16x8xf32>, vector<8x8xf32> -> vector<8x8xf32>
    %37 = math.roundeven %36 : vector<8x8xf32>
    %c2_30 = arith.constant 2 : index
    %38 = memref.load %arg1[%c2_30] : memref<3xf32, #tpu.memory_space<smem>>
    %39 = vector.broadcast %38 : f32 to vector<8x8xf32>
    %40 = arith.mulf %37, %39 : vector<8x8xf32>
    %c2_31 = arith.constant 2 : index
    %41 = memref.load %arg2[%c2_31] : memref<3xf32, #tpu.memory_space<smem>>
    %42 = vector.broadcast %41 : f32 to vector<8x8xf32>
    %43 = arith.subf %40, %42 : vector<8x8xf32>
    %c0_32 = arith.constant 0 : index
    %c2_33 = arith.constant 2 : index
    %c0_34 = arith.constant 0 : index
    %c0_35 = arith.constant 0 : index
    %44 = vector.load %arg6[%c0_32, %c2_33, %c0_34, %c0_35] : memref<1x3x8x8xf32, #tpu.memory_space<vmem>>, vector<1x1x8x8xf32>
    %45 = vector.shape_cast %44 : vector<1x1x8x8xf32> to vector<8x8xf32>
    %46 = vector.shape_cast %43 : vector<8x8xf32> to vector<1x1x8x8xf32>
    tpu.vector_store %arg6[%c0_32, %c2_33, %c0_34, %c0_35], %46 {strides = array<i32>} : memref<1x3x8x8xf32, #tpu.memory_space<vmem>>, vector<1x1x8x8xf32>,
    return
  }
  func.func @transform_0(%arg0: i32) -> i32 {
    %c0_i32 = arith.constant 0 : i32
    %c0_i32_0 = arith.constant 0 : i32
    return %c0_i32 : i32
  }
  func.func @transform_1(%arg0: i32) -> i32 {
    %c0_i32 = arith.constant 0 : i32
    %c0_i32_0 = arith.constant 0 : i32
    return %c0_i32 : i32
  }
  func.func @transform_2(%arg0: i32) -> (i32, i32) {
    %c0_i32 = arith.constant 0 : i32
    %c0_i32_0 = arith.constant 0 : i32
    %c0_i32_1 = arith.constant 0 : i32
    return %c0_i32, %c0_i32_0 : i32, i32
  }
  func.func @transform_3(%arg0: i32) -> (i32, i32) {
    %c0_i32 = arith.constant 0 : i32
    %c0_i32_0 = arith.constant 0 : i32
    %c0_i32_1 = arith.constant 0 : i32
    return %c0_i32, %c0_i32_0 : i32, i32
  }
  func.func @transform_4(%arg0: i32) -> (i32, i32, i32, i32) {
    %c0_i32 = arith.constant 0 : i32
    %c0_i32_0 = arith.constant 0 : i32
    %c0_i32_1 = arith.constant 0 : i32
    %c0_i32_2 = arith.constant 0 : i32
    return %arg0, %c0_i32, %c0_i32_0, %c0_i32_1 : i32, i32, i32, i32
  }
  func.func @transform_5(%arg0: i32) -> (i32, i32, i32, i32) {
    %c0_i32 = arith.constant 0 : i32
    %c0_i32_0 = arith.constant 0 : i32
    %c0_i32_1 = arith.constant 0 : i32
    %c0_i32_2 = arith.constant 0 : i32
    return %arg0, %c0_i32, %c0_i32_0, %c0_i32_1 : i32, i32, i32, i32
  }
}

</mosaic_0001>

<bundles_post_ra>
// kernel: tpu_custom_call.1
= control target key start
LH: loop header
LB: loop body
LE: loop exit
PB: predicated region body
PF: predicated region fallthrough
CT: control target
= control target key end

     0   :  { %10 = vsyncpa [#allocation4], 0  ;;  %s1334_s0 = inlined_call_operand.vmem [shape: f32[3], index: 0, kind: input, shape index: {}]   ;;  %s1335_s1 = inlined_call_operand.vmem [shape: f32[3], index: 1, kind: input, shape index: {}]   ;;  %s1336_s2 = inlined_call_operand.vmem [shape: f32[8,16], index: 2, kind: input, shape index: {}]   ;;  %s1337_s3 = inlined_call_operand.vmem [shape: f32[16,8], index: 3, kind: input, shape index: {}]   ;;  %s1338_s4 = inlined_call_operand.vmem [shape: u8[2,3,16,16], index: 4, kind: input, shape index: {}]   ;;  %s1339_s5 = inlined_call_operand.hbm [shape: f32[2,3,8,8], index: 5, kind: output, shape index: {}]  }
   0x1   :  { %11 = vsyncpa [#allocation6], 0 }
   0x2   :  { %12 = vsyncpa [#allocation3], 0 }
   0x3   :  { %14 = vsyncpa [#allocation3 + $0x1], 0  ;;  %s1168_s18 = smov 0   ;;  %s1170_s19 = smov 0  }
   0x4   :  { %s1172_s20 = smov 0   ;;  %s1174_s21 = smov 0  }
   0x5 LB: > { %s1189_s22 = sadd.s32 4294967295, %s1128_s21   ;;  %s837_s23 = sadd.s32 4294967294, %s1128_s21   ;;  %s1128_s21 = sphi %s1174_s21, %s1357_s21   ;;  %s1124_s20 = sphi %s1172_s20, %s1356_s20   ;;  %s1120_s19 = sphi %s1170_s19, %s1355_s19   ;;  %s1116_s18 = sphi %s1168_s18, %s1354_s18  }
   0x6   : > { %s1193_s24 = sadd.s32 1, %s1128_s21   ;;  %s137_s25 = sadd.s32 1, %s1124_s20 }
   0x7   : > { %s134_s26 = ssub.s32 %s1128_s21, %s1193_s24  ;;  %p147_p0 = scmp.ne.s32.totalorder %s1124_s20, %s1120_s19 }
   0x8   : > { %p135_p1 = scmp.eq.s32.totalorder %s134_s26, 0  ;;  %p148_p2 = scmp.eq.s32.totalorder %s1189_s22, 1 }
   0x9   : > { %p153_p3 = scmp.ne.s32.totalorder %s1120_s19, %s1116_s18  ;;  %p154_p4 = scmp.eq.s32.totalorder %s837_s23, 1 }
   0xa   : > { %s1204_s27 = scalar_select %p135_p1, %s1124_s20, %s137_s25  }
   0xb   : > { %p1206_p5 = por %p148_p2, %p147_p0  ;;  %p1210_p6 = por %p154_p4, %p153_p3 }
   0xc   : > { %p838_p7 = scmp.ge.s32.totalorder %s1128_s21, 1  ;;  %p161_p8 = scmp.lt.s32.totalorder %s1128_s21, 3 }
   0xd   : > { %s1343_s28 = scalar_select %p1206_p5, 1, 0 }
   0xe   : > { %s1344_s29 = scalar_select %p1210_p6, 1, 0 }
   0xf   : > { %p1340_p9 = scmp.eq.s32.totalorder %s1189_s22, 0  ;;  %p1217_p10 = pnand %p838_p7, %p161_p8 }
  0x10   : > { %s174_s8 = sshll.u32 %s1334_s0, 4  ;;  %s185_s11 = sshll.u32 %s1335_s1, 4  ;;  %s175_s8 = int_to_ptr.vmem [resolvable:$true] %s174_s8  ;;  %s186_s11 = int_to_ptr.vmem [resolvable:$true] %s185_s11 }
  0x11   : > { %s1345_s30 = scalar_select %p1217_p10, 1, 0 }
  0x12   : > { %p973_p11 = pneg %p1217_p10  ;;  %s1028_s13 = scalar_lea.vmem %s175_s8, 16 }
  0x13   : > { %p1029_p13 = scmp.ne.s32.totalorder %s175_s8, %s1028_s13  ;;  %p1036_p3 = scmp.lt.s32.totalorder %s175_s8, %s175_s8 }
  0x14   : > { %p1231_p12 = pnand %p1340_p9, %p973_p11  ;;  %p1037_p4 = scmp.lt.s32.totalorder %s1028_s13, %s1028_s13 }
  0x16   : > { %p1030_p0 = pneg %p1231_p12  ;;  %p1038_p7 = por %p1037_p4, %p1036_p3 }
  0x18   : > { %p1031_p1 = pnand %p1030_p0, %p1029_p13 }
  0x1a   : > { %p1032_p2 = pneg %p1031_p1 }
  0x1c   : > { %p1039_p8 = pnand %p1038_p7, %p1032_p2 }
  0x1e   : > { %1042 = shalt.err (!%p1039_p8)
}
  0x1f   : > { %s1130_s14 = smov [#allocation2]   ;;  %s1043_s15 = scalar_lea.vmem %s186_s11, 16 }
  0x20   : > { %976 = dma.vmem_to_smem (!%p1231_p12), %s175_s8, 16, %s1130_s14, [#allocation4]  }
  0x21   : > { %p1044_p11 = scmp.ne.s32.totalorder %s186_s11, %s1043_s15  ;;  %p1051_p5 = scmp.lt.s32.totalorder %s186_s11, %s186_s11 }
  0x22   : > { %p1052_p10 = scmp.lt.s32.totalorder %s1043_s15, %s1043_s15 }
  0x23   : > { %p1046_p9 = pnand %p1044_p11, %p1030_p0 }
  0x24   : > { %p1053_p13 = por %p1052_p10, %p1051_p5 }
  0x25   : > { %p1047_p6 = pneg %p1046_p9 }
  0x27   : > { %p1054_p1 = pnand %p1053_p13, %p1047_p6 }
  0x29   : > { %1057 = shalt.err (!%p1054_p1)
}
  0x2a   : > { %s1131_s16 = smov [#allocation5]   ;;  %p1347_p2 = scmp.ne.s32.totalorder %s1345_s30, 0 }
  0x2b   : > { %979 = dma.vmem_to_smem (!%p1231_p12), %s186_s11, 16, %s1131_s16, [#allocation6]  }
  0x2c   : > { %212 = sbr.rel (%p1347_p2) target bundleno = 530 (0x212), region = 40  ;;  %p1348_p3 = scmp.eq.s32.totalorder (!%p1347_p2), %s1189_s22, 0 }
  0x33   : > { %1103 = dma.done.wait (%p1348_p3), [#allocation4], 16   ;;  %p1349_p4 = pmov %p1348_p3 }
  0x34   : > { %p1350_p9 = pmov %p1348_p3 }
  0x35   : > { %1105 = vsyncadd (%p1349_p4), [#allocation4], 4294967280 }
  0x36   : > { %1107 = dma.done.wait (%p1350_p9), [#allocation6], 16   ;;  %p1351_p5 = pmov %p1348_p3 }
  0x38   : > { %1109 = vsyncadd (%p1351_p5), [#allocation6], 4294967280 }
  0x39   : > { %222 = sfence }
  0x3a   : > { %p245_p6 = scmp.lt.s32.totalorder %s1189_s22, 1  ;;  %v1132_v0 = vmov 0.0|0.0   ;;  %vm1133_vm0 = vmmov 0   ;;  %v1134_v1 = vmov 0.0   ;;  %v251_v2 = vld [vmem:[%s1337_s3] sm:$0xff]  ;;  %v252_v3 = vld [vmem:[%s1337_s3 + $0x8] sm:$0xff] }
  0x3b   : > { %937 = vmatprep.subr.bf16.mxu0 %v1132_v0  ;;  %899 = vmatprep.mubr.msk.f32.mxu0 %vm1133_vm0, %v1134_v1  ;;  %v941_v4 = vpack.c.bf16 %v252_v3, %v251_v2  ;;  %v250_v24 = vld [vmem:[%s1336_s2] sm:$0xff]  ;;  %vm261_vm1 = vcmask 130048   ;;  %s409_s12 = sld [smem:[#allocation2]]  ;;  %s852_s14 = sld [smem:[#allocation2 + $0x1]]  ;;  %vm415_vm2 = vcmask 64512  }
  0x3c   : > { %s246_s30 = scalar_select %p245_p6, %s1189_s22, 1  ;;  %940 = vmatprep.subr.bf16.mxu1 %v1132_v0  ;;  %906 = vmatprep.mubr.msk.f32.mxu1 %vm1133_vm0, %v1134_v1 }
  0x3d   : > { %942 = vmatpush3.bf16.msra.mxu1 %v941_v4  ;;  %s412_s13 = sld [smem:[#allocation5]]  ;;  %s242_s15 = sand.u32 1, %s1120_s19  }
  0x3e   : > { %s958_s6 = smul.u32 12, %s246_s30  ;;  %946 = vmatprep.subr.bf16.mxu1 %v1132_v0  ;;  %s853_s16 = sld [smem:[#allocation5 + $0x1]] }
  0x3f   : > { %s957_s17 = smul.u32 24, %s242_s15  ;;  %s859_s23 = sld [smem:[#allocation2 + $0x2]] }
  0x40   : > { %s249_s9 = scalar_lea.vmem %s1338_s4, %s958_s6  ;;  %s860_s25 = sld [smem:[#allocation5 + $0x2]] }
  0x41   : > { %v866_v5 = vld [vmem:[%s249_s9] sm:$0xff]   ;;  %v956_v6 = vld [vmem:[%s249_s9 + $0x8] sm:$0xf]   ;;  %v410_v36 = vstv %s409_s12  ;;  %v571_v42 = vstv %s852_s14  ;;  %s244_s26 = scalar_lea.vmem [#allocation7], %s957_s17  ;;  %s962_s30 = smul.u32 384, %s1189_s22 }
  0x42   : > { %v867_v7 = vunpack.c.0.s8 %v866_v5  ;;  %v868_v8 = vunpack.c.1.s8 %v866_v5  ;;  %v871_v9 = vunpack.c.2.s8 %v866_v5  ;;  %v872_v10 = vunpack.c.3.s8 %v866_v5  ;;  %s753_s6 = sshll.u32 %s244_s26, 4  ;;  %s1293_s22 = scalar_lea.sflag [#allocation3], %s242_s15  ;;  %s1288_s6 = int_to_ptr.vmem [resolvable:$true] %s753_s6 }
  0x43   : > { %v875_v11 = vunpack.c.0.s8 %v956_v6  ;;  %v876_v12 = vunpack.c.1.s8 %v956_v6  ;;  %v413_v39 = vstv %s412_s13  ;;  %s1286_s9 = scalar_lea.hbm %s1339_s5, %s962_s30  ;;  %s1058_s10 = scalar_lea.vmem %s1288_s6, 384 }
  0x44   : > { %v257_v13 = vand.u32 255, %v867_v7  ;;  %v258_v14 = vand.u32 255, %v868_v8  ;;  %v422_v15 = vand.u32 255, %v871_v9  ;;  %v423_v16 = vand.u32 255, %v872_v10  ;;  %p1059_p10 = scmp.ne.s32.totalorder %s1288_s6, %s1058_s10  ;;  %p1352_p12 = scmp.ne.s32.totalorder %s1343_s28, 0 }
  0x45   : > { %v583_v17 = vand.u32 255, %v875_v11  ;;  %v584_v18 = vand.u32 255, %v876_v12  ;;  %v574_v46 = vstv %s853_s16  ;;  %v732_v49 = vstv %s859_s23  ;;  %s1135_s11 = smov [#allocation7]  }
  0x46   : > { %v259_v19 = vcvt.s32.f32 %v257_v13  ;;  %v260_v20 = vcvt.s32.f32 %v258_v14  ;;  %v424_v21 = vcvt.s32.f32 %v422_v15  ;;  %v425_v22 = vcvt.s32.f32 %v423_v16  ;;  %p1060_p0 = pnand %p1059_p10, %p1352_p12  ;;  %s1062_s12 = sshll.u32 %s1135_s11, 4  ;;  %s1063_s12 = int_to_ptr.vmem [resolvable:$false] %s1062_s12 }
  0x47   : > { %v585_v26 = vcvt.s32.f32 %v583_v17  ;;  %v586_v27 = vcvt.s32.f32 %v584_v18  ;;  %v735_v53 = vstv %s860_s25  ;;  %s1064_s13 = scalar_lea.vmem %s1063_s12, 768  ;;  %p1065_p8 = scmp.lt.s32.totalorder %s1288_s6, %s1063_s12 }
  0x48   : > { %v938_v23 = vpack.c.bf16 %v260_v20, %v259_v19  ;;  %v944_v25 = vpack.c.bf16 %v425_v22, %v424_v21  ;;  %p1061_p7 = pneg %p1060_p0  ;;  %p1066_p11 = scmp.lt.s32.totalorder %s1064_s13, %s1058_s10 }
  0x49   : > { %v950_v28 = vpack.c.bf16 %v586_v27, %v585_v26 }
  0x4a   : > { %939 = vmatpush3.bf16.msra.mxu0 %v938_v23  ;;  %p1067_p13 = por %p1066_p11, %p1065_p8 }
  0x4b   : > { %943 = vmatprep.subr.bf16.mxu0 %v1132_v0 }
  0x4c   : > { %p1068_p1 = pnand %p1067_p13, %p1061_p7 }
  0x4d   : > { %900 = vmatmul.mubr.msk.f32.vlgmr.msra.gmra.mrb[0].mxu0 %vm261_vm1, %v250_v24 }
  0x4e   : > { %945 = vmatpush3.bf16.msra.mxu0 %v944_v25  ;;  %913 = vmatprep.mubr.msk.f32.mxu0 %vm1133_vm0, %v1134_v1 }
  0x4f   : > { %949 = vmatprep.subr.bf16.mxu0 %v1132_v0 }
  0x51   : > { %914 = vmatmul.mubr.msk.f32.vlgmr.msra.gmra.mrb[2].mxu0 %vm261_vm1, %v250_v24 }
  0x52   : > { %951 = vmatpush3.bf16.msra.mxu0 %v950_v28  ;;  %927 = vmatprep.mubr.msk.f32.mxu0 %vm1133_vm0, %v1134_v1 }
  0x55   : > { %928 = vmatmul.mubr.msk.f32.vlgmr.msra.gmra.mrb[4].mxu0 %vm261_vm1, %v250_v24 }
 0x120   : > { %v331_v29 = vpop.f32.mrb[0].mxu0 }
 0x121   : > { %v901_v30 = vpop.f32.mrb[1].mxu0  ;;  %907 = vmatmul.mubr.msk.f32.vlgmr.msra.gmra.mrb[0].mxu1 %vm261_vm1, %v331_v29 }
 0x122   : > { %948 = vmatpush3.bf16.msra.mxu1 %v941_v4  ;;  %920 = vmatprep.mubr.msk.f32.mxu1 %vm1133_vm0, %v1134_v1 }
 0x123   : > { %952 = vmatprep.subr.bf16.mxu1 %v1132_v0 }
 0x124   : > { %v492_v31 = vpop.f32.mrb[2].mxu0 }
 0x125   : > { %v915_v32 = vpop.f32.mrb[3].mxu0  ;;  %921 = vmatmul.mubr.msk.f32.vlgmr.msra.gmra.mrb[2].mxu1 %vm261_vm1, %v492_v31 }
 0x126   : > { %954 = vmatpush3.bf16.msra.mxu1 %v941_v4  ;;  %934 = vmatprep.mubr.msk.f32.mxu1 %vm1133_vm0, %v1134_v1 }
 0x128   : > { %v653_v33 = vpop.f32.mrb[4].mxu0 }
 0x129   : > { %v929_v34 = vpop.f32.mrb[5].mxu0  ;;  %935 = vmatmul.mubr.msk.f32.vlgmr.msra.gmra.mrb[4].mxu1 %vm261_vm1, %v653_v33 }
 0x1f4   : > { %v404_v35 = vpop.f32.mrb[0].mxu1 }
 0x1f5   : > { %v959_v37 = vround.rtne.f32 %v404_v35  ;;  %v908_v38 = vpop.f32.mrb[1].mxu1 }
 0x1f7   : > { %v411_v40 = vmul.f32 %v959_v37, %v410_v36 }
 0x1f8   : > { %v565_v41 = vpop.f32.mrb[2].mxu1 }
 0x1f9   : > { %v414_v43 = vsub.f32 %v411_v40, %v413_v39  ;;  %v960_v44 = vround.rtne.f32 %v565_v41  ;;  %v922_v45 = vpop.f32.mrb[3].mxu1 }
 0x1fb   : > { %416 = vst.msk [vmem:[%s244_s26] sm:$0xff] %vm415_vm2, %v414_v43  ;;  %v572_v47 = vmul.f32 %v960_v44, %v571_v42 }
 0x1fc   : > { %v726_v48 = vpop.f32.mrb[4].mxu1 }
 0x1fd   : > { %v575_v50 = vsub.f32 %v572_v47, %v574_v46  ;;  %v961_v51 = vround.rtne.f32 %v726_v48  ;;  %v936_v52 = vpop.f32.mrb[5].mxu1 }
 0x1ff   : > { %854 = vst.msk [vmem:[%s244_s26 + $0x8] sm:$0xff] %vm415_vm2, %v575_v50  ;;  %v733_v54 = vmul.f32 %v961_v51, %v732_v49 }
 0x201   : > { %v736_v55 = vsub.f32 %v733_v54, %v735_v53 }
 0x203   : > { %861 = vst.msk [vmem:[%s244_s26 + $0x10] sm:$0xff] %vm415_vm2, %v736_v55 }
 0x204   : > { %1071 = shalt.err (!%p1068_p1)
}
 0x205   : > { %s1072_s14 = scalar_lea.hbm %s1286_s9, 384  ;;  %s1076_s17 = scalar_lea.hbm %s1339_s5, 768 }
 0x206   : > { %p1073_p2 = scmp.ne.s32.totalorder %s1286_s9, %s1072_s14  ;;  %p1077_p9 = scmp.lt.u32.totalorder %s1286_s9, %s1339_s5 }
 0x207   : > { %p1078_p5 = scmp.lt.u32.totalorder %s1076_s17, %s1072_s14  ;;  %p1080_p10 = scmp.lt.u32.totalorder %s1072_s14, %s1286_s9 }
 0x208   : > { %p1074_p3 = pnand %p1073_p2, %p1352_p12 }
 0x209   : > { %p1079_p6 = por %p1078_p5, %p1077_p9 }
 0x20a   : > { %p1075_p4 = pneg %p1074_p3 }
 0x20b   : > { %p1081_p0 = por %p1080_p10, %p1079_p6 }
 0x20d   : > { %p1082_p7 = pnand %p1081_p0, %p1075_p4 }
 0x20f   : > { %1085 = shalt.err (!%p1082_p7)
}
 0x210   : > { %s1136_s26 = smov 128   ;;  %s1137_s30 = smov 8  }
 0x211   : > { %971 = dma.vmem_to_hbm [thread:$0]  (%p1352_p12), %s1288_s6, 384, %s1286_s9, %s1293_s22, %s1136_s26, %s1136_s26, %s1137_s30  }
 0x212 PF: > { %p988_p8 = scmp.ge.s32.totalorder %s1128_s21, 2  ;;  %s768_s7 = sand.u32 1, %s1116_s18  }
 0x213   : > { %p1353_p11 = scmp.ne.s32.totalorder %s1344_s29, 0  ;;  %s769_s8 = scalar_lea.sflag [#allocation3], %s768_s7 }
 0x215   : > { %p981_p13 = pnand %p988_p8, %p1353_p11 }
 0x217   : > { %1111 = dma.done.wait (!%p981_p13), %s769_s8, 384  }
 0x218   : > { %1113 = vsyncadd (!%p981_p13), %s769_s8, 4294966912  ;;  %p17_p1 = scmp.ge.s32.totalorder %s1193_s24, 4   ;;  %s1354_s18 = smov %s1120_s19 }
 0x219   : > { %s1355_s19 = smov %s1124_s20  ;;  %s1356_s20 = smov %s1204_s27 }
 0x21a   : > { %s1357_s21 = smov %s1193_s24  ;;  %19 = sbr.rel (!%p17_p1) target bundleno = 5 (0x5), region = 88 }
 0x221   :  { %774 = vsyncpa [#allocation3], 1 }
 0x222   :  { %776 = vsyncpa [#allocation3 + $0x1], 1 }
 0x223   :  { %777 = vsyncpa [#allocation4], 1 }
 0x224   :  { %779 = vsyncpa [#allocation4 + $0x1], 1 }
 0x225   :  { %780 = vsyncpa [#allocation6], 1 }

</bundles_post_ra>
